<compile_context>
chip_gen: v5e
topology: v5e:2x2
jax: 0.10.0
libtpu: 0.0.40
codegen_flags: <defaults>
</compile_context>

<pallas_src>
import functools

import jax
import jax.numpy as jnp
from jax.experimental import pallas as pl
from jax.experimental.pallas import tpu as pltpu

LANE = 128
NEG_BIG = -1e9  # sigmoid(NEG_BIG) == 0.0 exactly in f32


def _dice_kernel(x_ref, t_ref, o_ref, acc_i, acc_d, *, smooth):
    i = pl.program_id(0)

    @pl.when(i == 0)
    def _init():
        acc_i[...] = jnp.zeros_like(acc_i)
        acc_d[...] = jnp.zeros_like(acc_d)

    x = x_ref[...]
    t = t_ref[...]

    # EUP sigmoid; padding (if any) was pre-filled with NEG_BIG -> contributes 0.
    s = jax.nn.sigmoid(x)

    # Per-lane partial sums (sublane reduction only) into resident VMEM.
    acc_i[...] += jnp.sum(s * t, axis=0, keepdims=True)   # intersection
    acc_d[...] += jnp.sum(s + t, axis=0, keepdims=True)   # sum(s) + sum(t)

    @pl.when(i == pl.num_programs(0) - 1)
    def _finalize():
        # Single cross-lane (XLU) reduction at the very end.
        inter = jnp.sum(acc_i[...], keepdims=True)               # (1, 1)
        denom = jnp.sum(acc_d[...], keepdims=True)               # (1, 1)
        loss = 1.0 - (2.0 * inter + smooth) / (denom + smooth)   # (1, 1)
        o_ref[...] = jnp.broadcast_to(loss, o_ref.shape).astype(jnp.float32)


def dice_loss(inputs, targets, smooth=1e-6, max_block_rows=2048):
    """Fused Dice loss: scalar = 1 - dice(sigmoid(inputs), targets)."""
    x = inputs.reshape(-1).astype(jnp.float32)
    t = targets.reshape(-1).astype(jnp.float32)
    total = x.shape[0]

    # Lane-dense layout: (rows, 128). Block height is a multiple of 8
    # (sublane), large for pipelining, capped so tiny inputs are not blown up.
    rows = pl.cdiv(total, LANE)
    block_rows = min(max_block_rows, ((rows + 7) // 8) * 8)
    rows_padded = pl.cdiv(rows, block_rows) * block_rows
    padded_total = rows_padded * LANE
    pad = padded_total - total

    if pad:
        # Logit padding -> sigmoid == 0; target padding == 0 -> no sum pollution.
        x = jnp.pad(x, (0, pad), constant_values=NEG_BIG)
        t = jnp.pad(t, (0, pad))
    x = x.reshape(rows_padded, LANE)
    t = t.reshape(rows_padded, LANE)

    grid = (rows_padded // block_rows,)
    kernel = functools.partial(_dice_kernel, smooth=float(smooth))

    out = pl.pallas_call(
        kernel,
        out_shape=jax.ShapeDtypeStruct((1, LANE), jnp.float32),
        grid_spec=pltpu.PrefetchScalarGridSpec(
            num_scalar_prefetch=0,
            grid=grid,
            in_specs=[
                pl.BlockSpec((block_rows, LANE), lambda i: (i, 0)),
                pl.BlockSpec((block_rows, LANE), lambda i: (i, 0)),
            ],
            # Same output block across the whole (reduction) grid axis.
            out_specs=pl.BlockSpec((1, LANE), lambda i: (0, 0)),
            scratch_shapes=[pltpu.VMEM((1, LANE), jnp.float32)] * 2,
        ),
        compiler_params=pltpu.CompilerParams(
            dimension_semantics=("arbitrary",),
            vmem_limit_bytes=32 * 1024 * 1024),
    )(x, t)
    return out[0, 0]


if __name__ == "__main__":
    key = jax.random.PRNGKey(0)
    k_logits, k_targets = jax.random.split(key)

    shape = (2, 4, 16, 16)
    logits = jax.random.normal(k_logits, shape, jnp.float32)
    targets = (jax.random.uniform(k_targets, shape) > 0.5).astype(jnp.float32)

    loss_fn = jax.jit(dice_loss)
    loss = loss_fn(logits, targets)
    jax.block_until_ready(loss)

    # Pure-JAX reference (matches the PyTorch module semantics).
    s = jax.nn.sigmoid(logits).reshape(-1)
    tt = targets.reshape(-1)
    inter = jnp.sum(s * tt)
    ref = 1.0 - (2.0 * inter + 1e-6) / (jnp.sum(s) + jnp.sum(tt) + 1e-6)

    assert loss.shape == (), loss.shape
    assert bool(jnp.isfinite(loss)), loss
    assert bool(jnp.allclose(loss, ref, atol=1e-5, rtol=1e-5)), (loss, ref)

    # Also exercise a ragged (padding-required) size to verify the -1e9 pad path.
    shape2 = (3, 5, 7, 11)
    logits2 = jax.random.normal(k_logits, shape2, jnp.float32)
    targets2 = (jax.random.uniform(k_targets, shape2) > 0.5).astype(jnp.float32)
    loss2 = jax.jit(dice_loss)(logits2, targets2)
    jax.block_until_ready(loss2)
    s2 = jax.nn.sigmoid(logits2).reshape(-1)
    t2 = targets2.reshape(-1)
    ref2 = 1.0 - (2.0 * jnp.sum(s2 * t2) + 1e-6) / (jnp.sum(s2) + jnp.sum(t2) + 1e-6)
    assert bool(jnp.allclose(loss2, ref2, atol=1e-5, rtol=1e-5)), (loss2, ref2)

    print("KERNEL_OK")
</pallas_src>

<mosaic_0001>
module attributes {stable_mosaic.version = 11 : i64} {
  func.func @_dice_kernel(%arg0: i32, %arg1: memref<16x128xf32, #tpu.memory_space<vmem>>, %arg2: memref<16x128xf32, #tpu.memory_space<vmem>>, %arg3: memref<1x128xf32, #tpu.memory_space<vmem>>, %arg4: memref<1x128xf32, #tpu.memory_space<vmem>>, %arg5: memref<1x128xf32, #tpu.memory_space<vmem>>) attributes {dimension_semantics = [#tpu.dimension_semantics<arbitrary>], iteration_bounds = array<i64: 1>, scalar_prefetch = 0 : i64, scratch_operands = 2 : i64, tpu.core_type = #tpu.core_type<tc>, window_params = [{transform_indices = @transform_0, window_bounds = array<i64: 16, 128>}, {transform_indices = @transform_1, window_bounds = array<i64: 16, 128>}, {pipeline_mode = #tpu.pipeline_mode<synchronous>, transform_indices = @transform_2, window_bounds = array<i64: 1, 128>}]} {
    %c0_i32 = arith.constant 0 : i32
    %0 = arith.cmpi eq, %arg0, %c0_i32 : i32
    %1 = arith.extui %0 : i1 to i32
    %c0_i32_0 = arith.constant 0 : i32
    %2 = arith.cmpi ne, %1, %c0_i32_0 : i32
    scf.if %2 {
      %cst_16 = arith.constant 0.000000e+00 : f32
      %25 = vector.broadcast %cst_16 : f32 to vector<1x128xf32>
      %c0_17 = arith.constant 0 : index
      %c0_18 = arith.constant 0 : index
      %26 = vector.load %arg4[%c0_17, %c0_18] : memref<1x128xf32, #tpu.memory_space<vmem>>, vector<1x128xf32>
      tpu.vector_store %arg4[%c0_17, %c0_18], %25 {strides = array<i32>} : memref<1x128xf32, #tpu.memory_space<vmem>>, vector<1x128xf32>,
      %cst_19 = arith.constant 0.000000e+00 : f32
      %27 = vector.broadcast %cst_19 : f32 to vector<1x128xf32>
      %c0_20 = arith.constant 0 : index
      %c0_21 = arith.constant 0 : index
      %28 = vector.load %arg5[%c0_20, %c0_21] : memref<1x128xf32, #tpu.memory_space<vmem>>, vector<1x128xf32>
      tpu.vector_store %arg5[%c0_20, %c0_21], %27 {strides = array<i32>} : memref<1x128xf32, #tpu.memory_space<vmem>>, vector<1x128xf32>,
    } else {
    }
    %c0 = arith.constant 0 : index
    %c0_1 = arith.constant 0 : index
    %3 = vector.load %arg1[%c0, %c0_1] : memref<16x128xf32, #tpu.memory_space<vmem>>, vector<16x128xf32>
    %c0_2 = arith.constant 0 : index
    %c0_3 = arith.constant 0 : index
    %4 = vector.load %arg2[%c0_2, %c0_3] : memref<16x128xf32, #tpu.memory_space<vmem>>, vector<16x128xf32>
    %5 = arith.negf %3 : vector<16x128xf32>
    %6 = math.exp %5 : vector<16x128xf32>
    %cst = arith.constant 1.000000e+00 : f32
    %7 = vector.broadcast %cst : f32 to vector<16x128xf32>
    %8 = arith.addf %7, %6 : vector<16x128xf32>
    %9 = arith.divf %7, %8 : vector<16x128xf32>
    %c0_4 = arith.constant 0 : index
    %c0_5 = arith.constant 0 : index
    %10 = vector.load %arg4[%c0_4, %c0_5] : memref<1x128xf32, #tpu.memory_space<vmem>>, vector<1x128xf32>
    %11 = arith.mulf %9, %4 : vector<16x128xf32>
    %cst_6 = arith.constant dense<0.000000e+00> : vector<128xf32>
    %12 = vector.multi_reduction <add>, %11, %cst_6 [0] : vector<16x128xf32> to vector<128xf32>
    %13 = vector.shape_cast %12 : vector<128xf32> to vector<1x128xf32>
    %14 = arith.addf %10, %13 : vector<1x128xf32>
    %c0_7 = arith.constant 0 : index
    %c0_8 = arith.constant 0 : index
    %15 = vector.load %arg4[%c0_7, %c0_8] : memref<1x128xf32, #tpu.memory_space<vmem>>, vector<1x128xf32>
    tpu.vector_store %arg4[%c0_7, %c0_8], %14 {strides = array<i32>} : memref<1x128xf32, #tpu.memory_space<vmem>>, vector<1x128xf32>,
    %c0_9 = arith.constant 0 : index
    %c0_10 = arith.constant 0 : index
    %16 = vector.load %arg5[%c0_9, %c0_10] : memref<1x128xf32, #tpu.memory_space<vmem>>, vector<1x128xf32>
    %17 = arith.addf %9, %4 : vector<16x128xf32>
    %cst_11 = arith.constant dense<0.000000e+00> : vector<128xf32>
    %18 = vector.multi_reduction <add>, %17, %cst_11 [0] : vector<16x128xf32> to vector<128xf32>
    %19 = vector.shape_cast %18 : vector<128xf32> to vector<1x128xf32>
    %20 = arith.addf %16, %19 : vector<1x128xf32>
    %c0_12 = arith.constant 0 : index
    %c0_13 = arith.constant 0 : index
    %21 = vector.load %arg5[%c0_12, %c0_13] : memref<1x128xf32, #tpu.memory_space<vmem>>, vector<1x128xf32>
    tpu.vector_store %arg5[%c0_12, %c0_13], %20 {strides = array<i32>} : memref<1x128xf32, #tpu.memory_space<vmem>>, vector<1x128xf32>,
    %c0_i32_14 = arith.constant 0 : i32
    %22 = arith.cmpi eq, %arg0, %c0_i32_14 : i32
    %23 = arith.extui %22 : i1 to i32
    %c0_i32_15 = arith.constant 0 : i32
    %24 = arith.cmpi ne, %23, %c0_i32_15 : i32
    scf.if %24 {
      %c0_16 = arith.constant 0 : index
      %c0_17 = arith.constant 0 : index
      %25 = vector.load %arg4[%c0_16, %c0_17] : memref<1x128xf32, #tpu.memory_space<vmem>>, vector<1x128xf32>
      %26 = vector.shape_cast %25 : vector<1x128xf32> to vector<1x1x128xf32>
      %cst_18 = arith.constant dense<0.000000e+00> : vector<1xf32>
      %27 = vector.multi_reduction <add>, %26, %cst_18 [1, 2] : vector<1x1x128xf32> to vector<1xf32>
      %28 = vector.shape_cast %27 : vector<1xf32> to vector<1x1x1xf32>
      %29 = vector.extract %28[0, 0, 0] : f32 from vector<1x1x1xf32>
      %30 = vector.broadcast %29 : f32 to vector<1x1xf32>
      %c0_19 = arith.constant 0 : index
      %c0_20 = arith.constant 0 : index
      %31 = vector.load %arg5[%c0_19, %c0_20] : memref<1x128xf32, #tpu.memory_space<vmem>>, vector<1x128xf32>
      %32 = vector.shape_cast %31 : vector<1x128xf32> to vector<1x1x128xf32>
      %cst_21 = arith.constant dense<0.000000e+00> : vector<1xf32>
      %33 = vector.multi_reduction <add>, %32, %cst_21 [1, 2] : vector<1x1x128xf32> to vector<1xf32>
      %34 = vector.shape_cast %33 : vector<1xf32> to vector<1x1x1xf32>
      %35 = vector.extract %34[0, 0, 0] : f32 from vector<1x1x1xf32>
      %36 = vector.broadcast %35 : f32 to vector<1x1xf32>
      %cst_22 = arith.constant 2.000000e+00 : f32
      %37 = vector.broadcast %cst_22 : f32 to vector<1x1xf32>
      %38 = arith.mulf %37, %30 : vector<1x1xf32>
      %cst_23 = arith.constant 9.99999997E-7 : f32
      %39 = vector.broadcast %cst_23 : f32 to vector<1x1xf32>
      %40 = arith.addf %38, %39 : vector<1x1xf32>
      %cst_24 = arith.constant 9.99999997E-7 : f32
      %41 = vector.broadcast %cst_24 : f32 to vector<1x1xf32>
      %42 = arith.addf %36, %41 : vector<1x1xf32>
      %43 = arith.divf %40, %42 : vector<1x1xf32>
      %cst_25 = arith.constant 1.000000e+00 : f32
      %44 = vector.broadcast %cst_25 : f32 to vector<1x1xf32>
      %45 = arith.subf %44, %43 : vector<1x1xf32>
      %46 = vector.shape_cast %45 : vector<1x1xf32> to vector<1x1xf32>
      %47 = vector.broadcast %46 : vector<1x1xf32> to vector<1x128xf32>
      %c0_26 = arith.constant 0 : index
      %c0_27 = arith.constant 0 : index
      %48 = vector.load %arg3[%c0_26, %c0_27] : memref<1x128xf32, #tpu.memory_space<vmem>>, vector<1x128xf32>
      tpu.vector_store %arg3[%c0_26, %c0_27], %47 {strides = array<i32>} : memref<1x128xf32, #tpu.memory_space<vmem>>, vector<1x128xf32>,
    } else {
    }
    return
  }
  func.func @transform_0(%arg0: i32) -> (i32, i32) {
    %c0_i32 = arith.constant 0 : i32
    %c0_i32_0 = arith.constant 0 : i32
    return %arg0, %c0_i32 : i32, i32
  }
  func.func @transform_1(%arg0: i32) -> (i32, i32) {
    %c0_i32 = arith.constant 0 : i32
    %c0_i32_0 = arith.constant 0 : i32
    return %arg0, %c0_i32 : i32, i32
  }
  func.func @transform_2(%arg0: i32) -> (i32, i32) {
    %c0_i32 = arith.constant 0 : i32
    %c0_i32_0 = arith.constant 0 : i32
    %c0_i32_1 = arith.constant 0 : i32
    return %c0_i32, %c0_i32_0 : i32, i32
  }
}

</mosaic_0001>

<bundles_post_ra>
// kernel: dice_loss.1
= control target key start
LH: loop header
LB: loop body
LE: loop exit
PB: predicated region body
PF: predicated region fallthrough
CT: control target
= control target key end

     0   :  { %v192_v2 = vmov 0.0   ;;  %s224_s0 = inlined_call_operand.vmem [shape: f32[16,128], index: 0, kind: input, shape index: {}]   ;;  %s225_s1 = inlined_call_operand.vmem [shape: f32[16,128], index: 1, kind: input, shape index: {}]   ;;  %s226_s2 = inlined_call_operand.hbm [shape: f32[1,128], index: 2, kind: output, shape index: {}]  }
   0x1   :  { %v18_v0 = vld [vmem:[%s224_s0] sm:$0xff]  ;;  %v19_v1 = vld [vmem:[%s224_s0 + $0x8] sm:$0xff]  ;;  %16 = vst [vmem:[#allocation2] sm:$0x1] %v192_v2 }
   0x2   :  { %v148_v3 = vmul.f32 -1.442695, %v18_v0  ;;  %v149_v4 = vmul.f32 -1.442695, %v19_v1  ;;  %17 = vst [vmem:[#allocation3] sm:$0x1] %v192_v2 }
   0x3   :  { %7 = vsyncpa [#allocation5], 0  ;;  %v20_v24 = vld [vmem:[%s225_s1] sm:$0xff]  ;;  %v21_v26 = vld [vmem:[%s225_s1 + $0x8] sm:$0xff]  ;;  %vm88_vm8 = vcmask 1040384   ;;  %s193_s17 = smov [#allocation4]  }
   0x4   :  { %156 = vpow2.f32 %v148_v3  ;;  %s137_s18 = sshll.u32 %s193_s17, 4  ;;  %s139_s21 = sshll.u32 %s226_s2, 4  ;;  %s138_s18 = int_to_ptr.vmem [resolvable:$true] %s137_s18  ;;  %s140_s21 = int_to_ptr.hbm [resolvable:$true] %s139_s21 }
   0x5   :  { %158 = vpow2.f32 %v149_v4 }
   0x8   :  { %v60_v47 = vld [vmem:[#allocation2] sm:$0x1] }
   0x9   :  { %v72_v48 = vld [vmem:[#allocation3] sm:$0x1] }
   0xa   :  { %v157_v5 = vpop.eup %156 }
   0xb   :  { %v159_v6 = vpop.eup %158  ;;  %v28_v7 = vadd.f32 1.0, %v157_v5 }
   0xc   :  { %v29_v8 = vadd.f32 1.0, %v159_v6 }
   0xd   :  { %160 = vrcp.f32 %v28_v7  ;;  %vm35_vm0 = vweird.f32 %v28_v7  ;;  %v41_v12 = vand.u32 2147483648, %v28_v7  ;;  %v39_v15 = vand.u32 2147483647, %v28_v7 }
   0xe   :  { %162 = vrcp.f32 %v29_v8  ;;  %v56_v16 = vand.u32 2147483648, %v29_v8  ;;  %vm50_vm2 = vweird.f32 %v29_v8  ;;  %v54_v18 = vand.u32 2147483647, %v29_v8 }
   0xf   :  { %v42_v20 = vor.u32 1.1754944e-38, %v41_v12  ;;  %vm40_vm5 = vcmp.eq.f32.partialorder %v39_v15, 8.507059e+37 }
  0x10   :  { %v57_v23 = vor.u32 1.1754944e-38, %v56_v16  ;;  %vm55_vm7 = vcmp.eq.f32.partialorder %v54_v18, 8.507059e+37 }
  0x13   :  { %v161_v9 = vpop.eup %160 }
  0x14   :  { %v163_v10 = vpop.eup %162  ;;  %v31_v11 = vmul.f32 %v161_v9, %v28_v7  ;;  %vm36_vm1 = vweird.f32 %v161_v9 }
  0x15   :  { %v46_v13 = vmul.f32 %v163_v10, %v29_v8  ;;  %vm51_vm3 = vweird.f32 %v163_v10  ;;  %vm37_vm4 = vmor %vm35_vm0, %vm36_vm1 }
  0x16   :  { %v32_v14 = vsub.f32 1.0, %v31_v11  ;;  %vm52_vm6 = vmor %vm50_vm2, %vm51_vm3 }
  0x17   :  { %v47_v17 = vsub.f32 1.0, %v46_v13 }
  0x18   :  { %v33_v19 = vmul.f32 %v161_v9, %v32_v14 }
  0x19   :  { %v48_v21 = vmul.f32 %v163_v10, %v47_v17 }
  0x1a   :  { %v34_v22 = vadd.f32 %v161_v9, %v33_v19 }
  0x1b   :  { %v49_v25 = vadd.f32 %v163_v10, %v48_v21 }
  0x1c   :  { %v38_v27 = vsel %vm37_vm4, %v161_v9, %v34_v22 }
  0x1d   :  { %v43_v28 = vsel %vm40_vm5, %v42_v20, %v38_v27  ;;  %v53_v29 = vsel %vm52_vm6, %v163_v10, %v49_v25 }
  0x1e   :  { %v58_v30 = vsel %vm55_vm7, %v57_v23, %v53_v29  ;;  %v61_v31 = vmul.f32 %v43_v28, %v20_v24  ;;  %v73_v32 = vadd.f32 %v43_v28, %v20_v24 }
  0x1f   :  { %v62_v33 = vmul.f32 %v58_v30, %v21_v26  ;;  %v74_v34 = vadd.f32 %v58_v30, %v21_v26 }
  0x21   :  { %v63_v35 = vadd.f32 %v62_v33, %v61_v31  ;;  %v75_v36 = vadd.f32 %v74_v34, %v73_v32 }
  0x23   :  { %v64_v37 = vrot.slane %v63_v35, 4  ;;  %v76_v38 = vrot.slane %v75_v36, 4 }
  0x25   :  { %v65_v39 = vadd.f32 %v64_v37, %v63_v35  ;;  %v77_v40 = vadd.f32 %v76_v38, %v75_v36 }
  0x27   :  { %v66_v41 = vrot.slane %v65_v39, 2  ;;  %v78_v42 = vrot.slane %v77_v40, 2 }
  0x29   :  { %v67_v43 = vadd.f32 %v66_v41, %v65_v39  ;;  %v79_v44 = vadd.f32 %v78_v42, %v77_v40 }
  0x2b   :  { %v68_v45 = vrot.slane %v67_v43, 1  ;;  %v80_v46 = vrot.slane %v79_v44, 1 }
  0x2d   :  { %v69_v49 = vadd.f32 %v68_v45, %v67_v43  ;;  %v81_v50 = vadd.f32 %v80_v46, %v79_v44 }
  0x2f   :  { %v70_v51 = vadd.f32 %v69_v49, %v60_v47  ;;  %v82_v52 = vadd.f32 %v81_v50, %v72_v48 }
  0x31   :  { %71 = vst [vmem:[#allocation2] sm:$0x1] %v70_v51 }
  0x32   :  { %83 = vst [vmem:[#allocation3] sm:$0x1] %v82_v52 }
  0x38   :  { %v87_v53 = vld [vmem:[#allocation2] sm:$0x1] }
  0x39   :  { %v89_v54 = vsel %vm88_vm8, %v87_v53, 0.0  ;;  %v100_v55 = vld [vmem:[#allocation3] sm:$0x1] }
  0x3a   :  { %90 = vadd.xlane.f32.xlu0 %v89_v54  ;;  %v101_v56 = vsel %vm88_vm8, %v100_v55, 0.0 }
  0x42   :  { %102 = vadd.xlane.f32.xlu0 %v101_v56 }
  0xad   :  { %v91_v57 = vpop.xlane.xlu0 %90 }
  0xae   :  { %v92_v58 = vrot.slane %v91_v57, 4 }
  0xb0   :  { %v93_v59 = vadd.f32 %v92_v58, %v91_v57 }
  0xb2   :  { %v94_v60 = vrot.slane %v93_v59, 2 }
  0xb4   :  { %v95_v61 = vadd.f32 %v94_v60, %v93_v59 }
  0xb5   :  { %v103_v62 = vpop.xlane.xlu0 %102 }
  0xb6   :  { %v104_v63 = vrot.slane %v103_v62, 4  ;;  %v96_v0 = vrot.slane %v95_v61, 1 }
  0xb8   :  { %v105_v1 = vadd.f32 %v104_v63, %v103_v62  ;;  %v97_v2 = vadd.f32 %v96_v0, %v95_v61 }
  0xba   :  { %v106_v3 = vrot.slane %v105_v1, 2  ;;  %150 = vpush %v97_v2 }
  0xbc   :  { %v107_v4 = vadd.f32 %v106_v3, %v105_v1 }
  0xbe   :  { %v108_v5 = vrot.slane %v107_v4, 1 }
  0xc0   :  { %v109_v6 = vadd.f32 %v108_v5, %v107_v4 }
  0xc2   :  { %152 = vpush %v109_v6 }
  0xeb   :  { %s151_s1 = spop %150 }
  0xec   :  { %v99_v11 = vstv %s151_s1 }
  0xed   :  { %v112_v14 = vmul.f32 2.0, %v99_v11 }
  0xef   :  { %v113_v19 = vadd.f32 1e-06, %v112_v14 }
  0xf3   :  { %s153_s16 = spop %152 }
  0xf4   :  { %v111_v7 = vstv %s153_s16 }
  0xf5   :  { %v114_v8 = vadd.f32 1e-06, %v111_v7 }
  0xf7   :  { %164 = vrcp.f32 %v114_v8  ;;  %v126_v13 = vand.u32 2147483648, %v114_v8  ;;  %v124_v16 = vand.u32 2147483647, %v114_v8  ;;  %vm120_vm10 = vweird.f32 %v114_v8 }
  0xf9   :  { %v127_v18 = vor.u32 1.1754944e-38, %v126_v13  ;;  %vm125_vm12 = vcmp.eq.f32.partialorder %v124_v16, 8.507059e+37 }
  0xfd   :  { %v165_v9 = vpop.eup %164 }
  0xfe   :  { %v116_v10 = vmul.f32 %v165_v9, %v114_v8  ;;  %vm121_vm9 = vweird.f32 %v165_v9 }
  0xff   :  { %vm122_vm11 = vmor %vm120_vm10, %vm121_vm9 }
 0x100   :  { %v117_v12 = vsub.f32 1.0, %v116_v10 }
 0x102   :  { %v118_v15 = vmul.f32 %v165_v9, %v117_v12 }
 0x104   :  { %v119_v17 = vadd.f32 %v165_v9, %v118_v15 }
 0x106   :  { %v123_v20 = vsel %vm122_vm11, %v165_v9, %v119_v17 }
 0x107   :  { %v128_v21 = vsel %vm125_vm12, %v127_v18, %v123_v20 }
 0x108   :  { %v129_v22 = vmul.f32 %v128_v21, %v113_v19 }
 0x10a   :  { %v130_v23 = vsub.f32 1.0, %v129_v22 }
 0x10c   :  { %131 = vst [vmem:[#allocation4] sm:$0x1] %v130_v23 }
 0x10d   :  { %142 = dma.vmem_to_hbm [thread:$0]  %s138_s18, 16, %s140_s21, [#allocation5]  }
 0x10e   :  { %190 = dma.done.wait [#allocation5], 16  }
 0x10f   :  { %191 = vsyncadd [#allocation5], 4294967280 }
 0x110   :  { %147 = vsyncpa [#allocation5], 1 }

</bundles_post_ra>
